<compile_context>
chip_gen: v7x
topology: tpu7x:2x2x1
jax: 0.10.0
libtpu: 0.0.40
codegen_flags: <defaults>
</compile_context>

<pallas_src>
import functools

import jax
import jax.numpy as jnp
from jax import lax
from jax.experimental import pallas as pl
from jax.experimental.pallas import tpu as pltpu


# --------------------------------------------------------------------------
# Small helpers
# --------------------------------------------------------------------------
def _round_up(x, m):
    return ((x + m - 1) // m) * m


def _pad2(a, rows, cols, dtype):
    out = jnp.zeros((rows, cols), dtype)
    return out.at[: a.shape[0], : a.shape[1]].set(a.astype(dtype))


def _vmem_capacity_bytes():
    try:
        info = pltpu.get_tpu_info()
        cap = int(getattr(info, "vmem_capacity_bytes", 0))
        if cap > 0:
            return cap
    except Exception:
        pass
    return 64 * 1024 * 1024  # conservative (v7x-sized) fallback


def _parallel_tile(pad, preferred):
    cands = [t for t in (preferred, 512, 256, 128) if t <= pad and pad % t == 0]
    t = cands[0] if cands else pad
    # Keep at least 2 blocks on the parallel axis (megacore / 2-TC sharding).
    while pad // t < 2 and t > 128:
        t //= 2
    return t


def _reduction_candidates(pad):
    cands = [pad]
    for t in (4096, 2048, 1024, 512, 256, 128):
        if t < pad and pad % t == 0:
            cands.append(t)
    return cands


def _largest_fit(cands, cost_fn, budget):
    for t in cands:
        if cost_fn(t) <= budget:
            return t
    return cands[-1]


# --------------------------------------------------------------------------
# Kernels
# --------------------------------------------------------------------------
def _fused_kernel(inc_ref, incT_ref, se_ref, x_ref, dv_ref, x0_ref, wt_ref,
                  out_ref, acc_ref, *, alpha, beta, use_norm):
    """Single pass: per edge tile, Xe tile -> accumulate inc_T @ Xe; epilogue last."""
    k = pl.program_id(0)

    xe = jnp.dot(inc_ref[...], x_ref[...], preferred_element_type=jnp.float32)
    xe = xe * se_ref[...]                       # scatter-mean * degE, in f32
    part = jnp.dot(incT_ref[...], xe.astype(incT_ref.dtype),
                   preferred_element_type=jnp.float32)

    @pl.when(k == 0)
    def _():
        acc_ref[...] = part                     # direct write, no zero-fill pass

    @pl.when(k > 0)
    def _():
        acc_ref[...] += part

    @pl.when(k == pl.num_programs(0) - 1)
    def _():
        xv = acc_ref[...] * dv_ref[...]
        if use_norm:
            ss = jnp.sum(xv * xv, axis=1, keepdims=True)
            xv = xv * jnp.where(ss > 0.0, lax.rsqrt(ss), 0.0)
        xi = (1.0 - alpha) * xv + alpha * x0_ref[...].astype(jnp.float32)
        xw = jnp.dot(xi.astype(wt_ref.dtype), wt_ref[...],
                     preferred_element_type=jnp.float32)
        out_ref[...] = ((1.0 - beta) * xi + beta * xw).astype(out_ref.dtype)


def _edge_agg_kernel(inc_ref, x_ref, se_ref, xe_ref, acc_ref):
    """Stage 1: Xe = (inc @ X) * (degE / |e|)."""
    k = pl.program_id(1)
    part = jnp.dot(inc_ref[...], x_ref[...], preferred_element_type=jnp.float32)

    @pl.when(k == 0)
    def _():
        acc_ref[...] = part

    @pl.when(k > 0)
    def _():
        acc_ref[...] += part

    @pl.when(k == pl.num_programs(1) - 1)
    def _():
        xe_ref[...] = (acc_ref[...] * se_ref[...]).astype(xe_ref.dtype)


def _vertex_out_kernel(incT_ref, xe_ref, dv_ref, x0_ref, wt_ref, out_ref,
                       acc_ref, *, alpha, beta, use_norm):
    """Stage 2: Xv = (inc_T @ Xe) * degV -> norm -> residual -> W."""
    k = pl.program_id(1)
    part = jnp.dot(incT_ref[...], xe_ref[...], preferred_element_type=jnp.float32)

    @pl.when(k == 0)
    def _():
        acc_ref[...] = part

    @pl.when(k > 0)
    def _():
        acc_ref[...] += part

    @pl.when(k == pl.num_programs(1) - 1)
    def _():
        xv = acc_ref[...] * dv_ref[...]
        if use_norm:
            ss = jnp.sum(xv * xv, axis=1, keepdims=True)
            xv = xv * jnp.where(ss > 0.0, lax.rsqrt(ss), 0.0)
        xi = (1.0 - alpha) * xv + alpha * x0_ref[...].astype(jnp.float32)
        xw = jnp.dot(xi.astype(wt_ref.dtype), wt_ref[...],
                     preferred_element_type=jnp.float32)
        out_ref[...] = ((1.0 - beta) * xi + beta * xw).astype(out_ref.dtype)


# --------------------------------------------------------------------------
# pallas_call wrappers
# --------------------------------------------------------------------------
def _fused(inc_p, incT_p, se_p, x_p, dv_p, x0_p, wt_p, *, tile_e, n_pad, f_pad,
           alpha, beta, use_norm, vmem_limit):
    e_pad = inc_p.shape[0]
    kernel = functools.partial(_fused_kernel, alpha=float(alpha),
                               beta=float(beta), use_norm=bool(use_norm))
    return pl.pallas_call(
        kernel,
        out_shape=jax.ShapeDtypeStruct((n_pad, f_pad), jnp.float32),
        grid_spec=pltpu.PrefetchScalarGridSpec(
            num_scalar_prefetch=0,
            grid=(e_pad // tile_e,),
            in_specs=[
                pl.BlockSpec((tile_e, n_pad), lambda k: (k, 0)),   # inc (streamed)
                pl.BlockSpec((n_pad, tile_e), lambda k: (0, k)),   # inc_T (streamed)
                pl.BlockSpec((tile_e, 1), lambda k: (k, 0)),       # degE/|e|
                pl.BlockSpec((n_pad, f_pad), lambda k: (0, 0)),    # X (resident)
                pl.BlockSpec((n_pad, 1), lambda k: (0, 0)),        # degV (resident)
                pl.BlockSpec((n_pad, f_pad), lambda k: (0, 0)),    # X0 (resident)
                pl.BlockSpec((f_pad, f_pad), lambda k: (0, 0)),    # W^T (resident)
            ],
            out_specs=pl.BlockSpec((n_pad, f_pad), lambda k: (0, 0)),
            scratch_shapes=[pltpu.VMEM((n_pad, f_pad), jnp.float32)],
        ),
        compiler_params=pltpu.CompilerParams(
            dimension_semantics=("arbitrary",),
            vmem_limit_bytes=vmem_limit),
    )(inc_p, incT_p, se_p, x_p, dv_p, x0_p, wt_p)


def _stage1(inc_p, x_p, se_p, *, tile_e, tile_n, f_pad, out_dtype, vmem_limit):
    e_pad, n_pad = inc_p.shape
    grid = (e_pad // tile_e, n_pad // tile_n)
    return pl.pallas_call(
        _edge_agg_kernel,
        out_shape=jax.ShapeDtypeStruct((e_pad, f_pad), out_dtype),
        grid_spec=pltpu.PrefetchScalarGridSpec(
            num_scalar_prefetch=0,
            grid=grid,
            in_specs=[
                pl.BlockSpec((tile_e, tile_n), lambda i, k: (i, k)),  # inc
                pl.BlockSpec((tile_n, f_pad), lambda i, k: (k, 0)),   # X
                pl.BlockSpec((tile_e, 1), lambda i, k: (i, 0)),       # degE/|e|
            ],
            out_specs=pl.BlockSpec((tile_e, f_pad), lambda i, k: (i, 0)),
            scratch_shapes=[pltpu.VMEM((tile_e, f_pad), jnp.float32)],
        ),
        compiler_params=pltpu.CompilerParams(
            dimension_semantics=("parallel", "arbitrary"),
            vmem_limit_bytes=vmem_limit),
    )(inc_p, x_p, se_p)


def _stage2(incT_p, xe_p, dv_p, x0_p, wt_p, *, tile_n, tile_e, f_pad,
            alpha, beta, use_norm, vmem_limit):
    n_pad, e_pad = incT_p.shape
    grid = (n_pad // tile_n, e_pad // tile_e)
    kernel = functools.partial(_vertex_out_kernel, alpha=float(alpha),
                               beta=float(beta), use_norm=bool(use_norm))
    return pl.pallas_call(
        kernel,
        out_shape=jax.ShapeDtypeStruct((n_pad, f_pad), jnp.float32),
        grid_spec=pltpu.PrefetchScalarGridSpec(
            num_scalar_prefetch=0,
            grid=grid,
            in_specs=[
                pl.BlockSpec((tile_n, tile_e), lambda n, k: (n, k)),  # inc_T
                pl.BlockSpec((tile_e, f_pad), lambda n, k: (k, 0)),   # Xe
                pl.BlockSpec((tile_n, 1), lambda n, k: (n, 0)),       # degV
                pl.BlockSpec((tile_n, f_pad), lambda n, k: (n, 0)),   # X0
                pl.BlockSpec((f_pad, f_pad), lambda n, k: (0, 0)),    # W^T
            ],
            out_specs=pl.BlockSpec((tile_n, f_pad), lambda n, k: (n, 0)),
            scratch_shapes=[pltpu.VMEM((tile_n, f_pad), jnp.float32)],
        ),
        compiler_params=pltpu.CompilerParams(
            dimension_semantics=("parallel", "arbitrary"),
            vmem_limit_bytes=vmem_limit),
    )(incT_p, xe_p, dv_p, x0_p, wt_p)


# --------------------------------------------------------------------------
# Public API
# --------------------------------------------------------------------------
def build_unigcnii_operators(vertex, edges, num_vertices, num_edges, degE,
                             compute_dtype=jnp.bfloat16):
    """Build the (cached) dense incidence operators + per-edge scaling.

    Only depends on the hypergraph structure / degE: hoist out of the per-layer
    / per-step forward call.  compute_dtype=bf16 is the default on ALL chips
    (v5e's MXU supports bf16; all f32 work stays on accumulators).
    """
    N, E = int(num_vertices), int(num_edges)
    n_pad = _round_up(max(N, 1), 128)
    e_pad = _round_up(max(E, 1), 128)

    inc = jnp.zeros((E, N), jnp.float32).at[edges, vertex].add(1.0)
    cnt = jnp.sum(inc, axis=1, keepdims=True)                    # |e| incl. multiplicity
    scale_e = degE.astype(jnp.float32) / jnp.maximum(cnt, 1.0)   # scatter-mean * degE

    if jnp.dtype(compute_dtype) == jnp.dtype(jnp.bfloat16):
        max_mult = None
        try:
            max_mult = int(jax.device_get(jnp.max(inc))) if inc.size else 0
        except Exception:
            pass  # traced build: skip the host-side exactness check
        if max_mult is not None and max_mult > 256:
            raise ValueError("bf16 incidence is not exact for vertex multiplicity "
                             "> 256; use compute_dtype=jnp.float32")

    return dict(
        inc=_pad2(inc, e_pad, n_pad, compute_dtype),
        inc_T=_pad2(inc.T, n_pad, e_pad, compute_dtype),
        scale_e=_pad2(scale_e, e_pad, 1, jnp.float32),
        n_pad=n_pad, e_pad=e_pad,
        num_vertices=N, num_edges=E, compute_dtype=compute_dtype)


def unigcnii_conv(ops, X, X0, degV, W, alpha, beta, use_norm=False, path="auto"):
    """Pallas UniGCNIIConv.forward.

    ops : output of build_unigcnii_operators (cached across calls)
    X, X0 : (N, F) float32;  degV : (N, 1);  W : (F, F) = nn.Linear weight.
    path : "auto" | "fused" | "two_stage"
    """
    N, F = X.shape
    assert N == ops["num_vertices"]
    cdt = ops["compute_dtype"]
    cb = jnp.dtype(cdt).itemsize
    is_bf16 = jnp.dtype(cdt) == jnp.dtype(jnp.bfloat16)
    n_pad, e_pad = ops["n_pad"], ops["e_pad"]
    f_pad = _round_up(F, 128)

    # X0 is only consumed once in the f32 epilogue residual: ship it narrow on
    # the bf16 path, keep it f32 on the accuracy (f32) path.
    x0_dtype = jnp.bfloat16 if is_bf16 else jnp.float32
    x0b = jnp.dtype(x0_dtype).itemsize

    x_p = _pad2(X, n_pad, f_pad, cdt)
    x0_p = _pad2(X0, n_pad, f_pad, x0_dtype)
    dv_p = _pad2(degV, n_pad, 1, jnp.float32)
    # Ship W^T only; the (1-beta)*Xi residual is added in f32 in the epilogue.
    wt_p = _pad2(jnp.asarray(W, jnp.float32).T, f_pad, f_pad, cdt)

    cap = _vmem_capacity_bytes()            # 64 MiB on v7x, 128 MiB on v5e/v6e
    fit_budget = int(cap * 0.70)
    vmem_limit = int(cap * 0.85)
    slack = 2 * 1024 * 1024

    # ---- fused single-pass path -------------------------------------------
    def fused_cost(te):
        streamed = (4 * te * n_pad * cb            # inc + inc_T blocks (2 bufs each)
                    + 2 * te * 128 * 4             # scale_e block
                    + te * f_pad * (4 + cb))       # in-kernel Xe temporary
        resident = (2 * n_pad * f_pad * cb         # X
                    + 2 * n_pad * 128 * 4          # degV
                    + 2 * n_pad * f_pad * x0b      # X0
                    + 2 * f_pad * f_pad * cb       # W^T
                    + 2 * n_pad * f_pad * 4        # out
                    + n_pad * f_pad * 4            # f32 accumulator
                    + 4 * n_pad * f_pad * 4)       # epilogue temporaries
        return streamed + resident + slack

    use_fused = (path == "fused") or (path == "auto"
                                      and fused_cost(128) <= fit_budget)

    if use_fused:
        tile_e = _largest_fit(_reduction_candidates(e_pad), fused_cost, fit_budget)
        out_p = _fused(ops["inc"], ops["inc_T"], ops["scale_e"], x_p, dv_p, x0_p,
                       wt_p, tile_e=tile_e, n_pad=n_pad, f_pad=f_pad,
                       alpha=alpha, beta=beta, use_norm=use_norm,
                       vmem_limit=vmem_limit)
        return out_p[:N, :F]

    # ---- two-stage fallback -------------------------------------------------
    pref_par = 1024 if cap >= (96 << 20) else 512
    tile_e1 = _parallel_tile(e_pad, pref_par)

    def s1_cost(tn):
        return (2 * tile_e1 * tn * cb + 2 * tn * f_pad * cb
                + 2 * tile_e1 * 128 * 4 + 2 * tile_e1 * f_pad * cb
                + tile_e1 * f_pad * 4 + slack)

    tile_n1 = _largest_fit(_reduction_candidates(n_pad), s1_cost, fit_budget)

    tile_n2 = _parallel_tile(n_pad, pref_par)

    def s2_cost(te):
        return (2 * tile_n2 * te * cb + 2 * te * f_pad * cb
                + 2 * tile_n2 * 128 * 4 + 2 * tile_n2 * f_pad * x0b
                + 2 * f_pad * f_pad * cb + 3 * tile_n2 * f_pad * 4 + slack)

    tile_e2 = _largest_fit(_reduction_candidates(e_pad), s2_cost, fit_budget)

    xe_p = _stage1(ops["inc"], x_p, ops["scale_e"], tile_e=tile_e1,
                   tile_n=tile_n1, f_pad=f_pad, out_dtype=cdt,
                   vmem_limit=vmem_limit)
    out_p = _stage2(ops["inc_T"], xe_p, dv_p, x0_p, wt_p, tile_n=tile_n2,
                    tile_e=tile_e2, f_pad=f_pad, alpha=alpha, beta=beta,
                    use_norm=use_norm, vmem_limit=vmem_limit)
    return out_p[:N, :F]


# --------------------------------------------------------------------------
# Pure-JAX reference (torch_scatter semantics) + test
# --------------------------------------------------------------------------
def _reference(X, vertex, edges, alpha, beta, X0, degV, degE, W, E, use_norm):
    N, F = X.shape
    Xve = X[vertex]
    sum_e = jnp.zeros((E, F), X.dtype).at[edges].add(Xve)
    cnt_e = jnp.zeros((E,), X.dtype).at[edges].add(1.0)
    Xe = sum_e / jnp.maximum(cnt_e, 1.0)[:, None]            # scatter mean
    Xe = Xe * degE
    Xev = Xe[edges]
    Xv = jnp.zeros((N, F), X.dtype).at[vertex].add(Xev)      # scatter sum, dim_size=N
    Xv = Xv * degV
    if use_norm:
        rn = jnp.linalg.norm(Xv, axis=1, keepdims=True)
        Xv = Xv * jnp.where(rn > 0.0, 1.0 / rn, 0.0)
    Xi = (1.0 - alpha) * Xv + alpha * X0
    return (1.0 - beta) * Xi + beta * (Xi @ W.T)


if __name__ == "__main__":
    key = jax.random.PRNGKey(0)
    N, E, F = 16, 8, 32               # vertices, hyperedges, hidden dim (in == out)
    verts_per_edge = 4
    nnz = E * verts_per_edge

    k1, k2, k3, k4, k5, k6 = jax.random.split(key, 6)
    vertex = jax.random.randint(k1, (nnz,), 0, N, dtype=jnp.int32)
    edges = jnp.repeat(jnp.arange(E, dtype=jnp.int32), verts_per_edge)

    X = jax.random.normal(k2, (N, F), jnp.float32)
    X0 = jax.random.normal(k3, (N, F), jnp.float32)
    degV = jax.random.uniform(k4, (N, 1), jnp.float32, 0.5, 1.5)
    degE = jax.random.uniform(k5, (E, 1), jnp.float32, 0.5, 1.5)

    # Deterministic init of nn.Linear(F, F, bias=False).weight (kaiming-uniform bound).
    bound = 1.0 / (F ** 0.5)
    W = jax.random.uniform(k6, (F, F), jnp.float32, minval=-bound, maxval=bound)

    alpha, beta = 0.1, 0.5
    use_norm = True                    # args.UniGNN_use_norm

    ref = _reference(X, vertex, edges, alpha, beta, X0, degV, degE, W, E, use_norm)

    # Exercise both paths x both compute dtypes.
    for name, cdt, path, tol in (
        ("bf16/fused", jnp.bfloat16, "auto", 3e-2),
        ("bf16/two_stage", jnp.bfloat16, "two_stage", 3e-2),
        ("f32/fused", jnp.float32, "auto", 1e-3),
        ("f32/two_stage", jnp.float32, "two_stage", 1e-3),
    ):
        ops = build_unigcnii_operators(vertex, edges, N, E, degE,
                                       compute_dtype=cdt)
        out = jax.block_until_ready(
            unigcnii_conv(ops, X, X0, degV, W, alpha, beta, use_norm, path=path))
        assert out.shape == (N, F) and out.dtype == jnp.float32, name
        assert jnp.allclose(out, ref, atol=tol, rtol=tol), f"{name} mismatch"

    print("KERNEL_OK")
</pallas_src>

<mosaic_0001>
module attributes {stable_mosaic.version = 11 : i64} {
  func.func @_fused_kernel(%arg0: i32, %arg1: memref<128x128xbf16, #tpu.memory_space<vmem>>, %arg2: memref<128x128xbf16, #tpu.memory_space<vmem>>, %arg3: memref<128x1xf32, #tpu.memory_space<vmem>>, %arg4: memref<128x128xbf16, #tpu.memory_space<vmem>>, %arg5: memref<128x1xf32, #tpu.memory_space<vmem>>, %arg6: memref<128x128xbf16, #tpu.memory_space<vmem>>, %arg7: memref<128x128xbf16, #tpu.memory_space<vmem>>, %arg8: memref<128x128xf32, #tpu.memory_space<vmem>>, %arg9: memref<128x128xf32, #tpu.memory_space<vmem>>) attributes {dimension_semantics = [#tpu.dimension_semantics<arbitrary>], iteration_bounds = array<i64: 1>, scalar_prefetch = 0 : i64, scratch_operands = 1 : i64, tpu.core_type = #tpu.core_type<tc>, window_params = [{transform_indices = @transform_0, window_bounds = array<i64: 128, 128>}, {transform_indices = @transform_1, window_bounds = array<i64: 128, 128>}, {transform_indices = @transform_2, window_bounds = array<i64: 128, 1>}, {pipeline_mode = #tpu.pipeline_mode<synchronous>, transform_indices = @transform_3, window_bounds = array<i64: 128, 128>}, {pipeline_mode = #tpu.pipeline_mode<synchronous>, transform_indices = @transform_4, window_bounds = array<i64: 128, 1>}, {pipeline_mode = #tpu.pipeline_mode<synchronous>, transform_indices = @transform_5, window_bounds = array<i64: 128, 128>}, {pipeline_mode = #tpu.pipeline_mode<synchronous>, transform_indices = @transform_6, window_bounds = array<i64: 128, 128>}, {pipeline_mode = #tpu.pipeline_mode<synchronous>, transform_indices = @transform_7, window_bounds = array<i64: 128, 128>}]} {
    %c0 = arith.constant 0 : index
    %c0_0 = arith.constant 0 : index
    %0 = vector.load %arg1[%c0, %c0_0] : memref<128x128xbf16, #tpu.memory_space<vmem>>, vector<128x128xbf16>
    %c0_1 = arith.constant 0 : index
    %c0_2 = arith.constant 0 : index
    %1 = vector.load %arg4[%c0_1, %c0_2] : memref<128x128xbf16, #tpu.memory_space<vmem>>, vector<128x128xbf16>
    %cst = arith.constant dense<0.000000e+00> : vector<128x128xf32>
    %2 = tpu.matmul %0, %1, %cst {dimension_numbers = #tpu.dot_dimension_numbers<[1], [0], [0], [1], [0, 0, 1, 1], [], []>} : vector<128x128xbf16>, vector<128x128xbf16>, vector<128x128xf32> -> vector<128x128xf32>
    %c0_3 = arith.constant 0 : index
    %c0_4 = arith.constant 0 : index
    %3 = vector.load %arg3[%c0_3, %c0_4] : memref<128x1xf32, #tpu.memory_space<vmem>>, vector<128x1xf32>
    %4 = vector.broadcast %3 : vector<128x1xf32> to vector<128x128xf32>
    %5 = arith.mulf %2, %4 : vector<128x128xf32>
    %c0_5 = arith.constant 0 : index
    %c0_6 = arith.constant 0 : index
    %6 = vector.load %arg2[%c0_5, %c0_6] : memref<128x128xbf16, #tpu.memory_space<vmem>>, vector<128x128xbf16>
    %7 = arith.truncf %5 : vector<128x128xf32> to vector<128x128xbf16>
    %cst_7 = arith.constant dense<0.000000e+00> : vector<128x128xf32>
    %8 = tpu.matmul %6, %7, %cst_7 {dimension_numbers = #tpu.dot_dimension_numbers<[1], [0], [0], [1], [0, 0, 1, 1], [], []>} : vector<128x128xbf16>, vector<128x128xbf16>, vector<128x128xf32> -> vector<128x128xf32>
    %c0_i32 = arith.constant 0 : i32
    %9 = arith.cmpi eq, %arg0, %c0_i32 : i32
    %10 = arith.extui %9 : i1 to i32
    %c0_i32_8 = arith.constant 0 : i32
    %11 = arith.cmpi ne, %10, %c0_i32_8 : i32
    scf.if %11 {
      %c0_13 = arith.constant 0 : index
      %c0_14 = arith.constant 0 : index
      %18 = vector.load %arg9[%c0_13, %c0_14] : memref<128x128xf32, #tpu.memory_space<vmem>>, vector<128x128xf32>
      tpu.vector_store %arg9[%c0_13, %c0_14], %8 {strides = array<i32>} : memref<128x128xf32, #tpu.memory_space<vmem>>, vector<128x128xf32>,
    } else {
    }
    %c0_i32_9 = arith.constant 0 : i32
    %12 = arith.cmpi sgt, %arg0, %c0_i32_9 : i32
    %13 = arith.extui %12 : i1 to i32
    %c0_i32_10 = arith.constant 0 : i32
    %14 = arith.cmpi ne, %13, %c0_i32_10 : i32
    scf.if %14 {
      %c0_13 = arith.constant 0 : index
      %c0_14 = arith.constant 0 : index
      %18 = vector.load %arg9[%c0_13, %c0_14] : memref<128x128xf32, #tpu.memory_space<vmem>>, vector<128x128xf32>
      %19 = arith.addf %18, %8 : vector<128x128xf32>
      %c0_15 = arith.constant 0 : index
      %c0_16 = arith.constant 0 : index
      %20 = vector.load %arg9[%c0_15, %c0_16] : memref<128x128xf32, #tpu.memory_space<vmem>>, vector<128x128xf32>
      tpu.vector_store %arg9[%c0_15, %c0_16], %19 {strides = array<i32>} : memref<128x128xf32, #tpu.memory_space<vmem>>, vector<128x128xf32>,
    } else {
    }
    %c0_i32_11 = arith.constant 0 : i32
    %15 = arith.cmpi eq, %arg0, %c0_i32_11 : i32
    %16 = arith.extui %15 : i1 to i32
    %c0_i32_12 = arith.constant 0 : i32
    %17 = arith.cmpi ne, %16, %c0_i32_12 : i32
    scf.if %17 {
      %c0_13 = arith.constant 0 : index
      %c0_14 = arith.constant 0 : index
      %18 = vector.load %arg9[%c0_13, %c0_14] : memref<128x128xf32, #tpu.memory_space<vmem>>, vector<128x128xf32>
      %c0_15 = arith.constant 0 : index
      %c0_16 = arith.constant 0 : index
      %19 = vector.load %arg5[%c0_15, %c0_16] : memref<128x1xf32, #tpu.memory_space<vmem>>, vector<128x1xf32>
      %20 = vector.broadcast %19 : vector<128x1xf32> to vector<128x128xf32>
      %21 = arith.mulf %18, %20 : vector<128x128xf32>
      %22 = arith.mulf %21, %21 : vector<128x128xf32>
      %cst_17 = arith.constant dense<0.000000e+00> : vector<128xf32>
      %23 = vector.multi_reduction <add>, %22, %cst_17 [1] : vector<128x128xf32> to vector<128xf32>
      %24 = vector.shape_cast %23 : vector<128xf32> to vector<128x1xf32>
      %cst_18 = arith.constant 0.000000e+00 : f32
      %25 = vector.broadcast %cst_18 : f32 to vector<128x1xf32>
      %26 = arith.cmpf ogt, %24, %25 : vector<128x1xf32>
      %27 = math.rsqrt %24 : vector<128x1xf32>
      %cst_19 = arith.constant 0.000000e+00 : f32
      %28 = vector.broadcast %cst_19 : f32 to vector<128x1xf32>
      %29 = arith.select %26, %27, %28 : vector<128x1xi1>, vector<128x1xf32>
      %30 = vector.broadcast %29 : vector<128x1xf32> to vector<128x128xf32>
      %31 = arith.mulf %21, %30 : vector<128x128xf32>
      %cst_20 = arith.constant 0.899999976 : f32
      %32 = vector.broadcast %cst_20 : f32 to vector<128x128xf32>
      %33 = arith.mulf %32, %31 : vector<128x128xf32>
      %c0_21 = arith.constant 0 : index
      %c0_22 = arith.constant 0 : index
      %34 = vector.load %arg6[%c0_21, %c0_22] : memref<128x128xbf16, #tpu.memory_space<vmem>>, vector<128x128xbf16>
      %35 = arith.extf %34 : vector<128x128xbf16> to vector<128x128xf32>
      %cst_23 = arith.constant 1.000000e-01 : f32
      %36 = vector.broadcast %cst_23 : f32 to vector<128x128xf32>
      %37 = arith.mulf %36, %35 : vector<128x128xf32>
      %38 = arith.addf %33, %37 : vector<128x128xf32>
      %39 = arith.truncf %38 : vector<128x128xf32> to vector<128x128xbf16>
      %c0_24 = arith.constant 0 : index
      %c0_25 = arith.constant 0 : index
      %40 = vector.load %arg7[%c0_24, %c0_25] : memref<128x128xbf16, #tpu.memory_space<vmem>>, vector<128x128xbf16>
      %cst_26 = arith.constant dense<0.000000e+00> : vector<128x128xf32>
      %41 = tpu.matmul %39, %40, %cst_26 {dimension_numbers = #tpu.dot_dimension_numbers<[1], [0], [0], [1], [0, 0, 1, 1], [], []>} : vector<128x128xbf16>, vector<128x128xbf16>, vector<128x128xf32> -> vector<128x128xf32>
      %cst_27 = arith.constant 5.000000e-01 : f32
      %42 = vector.broadcast %cst_27 : f32 to vector<128x128xf32>
      %43 = arith.mulf %42, %38 : vector<128x128xf32>
      %cst_28 = arith.constant 5.000000e-01 : f32
      %44 = vector.broadcast %cst_28 : f32 to vector<128x128xf32>
      %45 = arith.mulf %44, %41 : vector<128x128xf32>
      %46 = arith.addf %43, %45 : vector<128x128xf32>
      %c0_29 = arith.constant 0 : index
      %c0_30 = arith.constant 0 : index
      %47 = vector.load %arg8[%c0_29, %c0_30] : memref<128x128xf32, #tpu.memory_space<vmem>>, vector<128x128xf32>
      tpu.vector_store %arg8[%c0_29, %c0_30], %46 {strides = array<i32>} : memref<128x128xf32, #tpu.memory_space<vmem>>, vector<128x128xf32>,
    } else {
    }
    return
  }
  func.func @transform_0(%arg0: i32) -> (i32, i32) {
    %c0_i32 = arith.constant 0 : i32
    %c0_i32_0 = arith.constant 0 : i32
    return %arg0, %c0_i32 : i32, i32
  }
  func.func @transform_1(%arg0: i32) -> (i32, i32) {
    %c0_i32 = arith.constant 0 : i32
    %c0_i32_0 = arith.constant 0 : i32
    return %c0_i32, %arg0 : i32, i32
  }
  func.func @transform_2(%arg0: i32) -> (i32, i32) {
    %c0_i32 = arith.constant 0 : i32
    %c0_i32_0 = arith.constant 0 : i32
    return %arg0, %c0_i32 : i32, i32
  }
  func.func @transform_3(%arg0: i32) -> (i32, i32) {
    %c0_i32 = arith.constant 0 : i32
    %c0_i32_0 = arith.constant 0 : i32
    %c0_i32_1 = arith.constant 0 : i32
    return %c0_i32, %c0_i32_0 : i32, i32
  }
  func.func @transform_4(%arg0: i32) -> (i32, i32) {
    %c0_i32 = arith.constant 0 : i32
    %c0_i32_0 = arith.constant 0 : i32
    %c0_i32_1 = arith.constant 0 : i32
    return %c0_i32, %c0_i32_0 : i32, i32
  }
  func.func @transform_5(%arg0: i32) -> (i32, i32) {
    %c0_i32 = arith.constant 0 : i32
    %c0_i32_0 = arith.constant 0 : i32
    %c0_i32_1 = arith.constant 0 : i32
    return %c0_i32, %c0_i32_0 : i32, i32
  }
  func.func @transform_6(%arg0: i32) -> (i32, i32) {
    %c0_i32 = arith.constant 0 : i32
    %c0_i32_0 = arith.constant 0 : i32
    %c0_i32_1 = arith.constant 0 : i32
    return %c0_i32, %c0_i32_0 : i32, i32
  }
  func.func @transform_7(%arg0: i32) -> (i32, i32) {
    %c0_i32 = arith.constant 0 : i32
    %c0_i32_0 = arith.constant 0 : i32
    %c0_i32_1 = arith.constant 0 : i32
    return %c0_i32, %c0_i32_0 : i32, i32
  }
}

</mosaic_0001>

<bundles_post_ra>
// kernel: tpu_custom_call.1
= control target key start
LH: loop header
LB: loop body
LE: loop exit
PB: predicated region body
PF: predicated region fallthrough
CT: control target
= control target key end

     0   :  { %12 = vsyncpa [#allocation4], 0  ;;  %s1952_s0 = inlined_call_operand.vmem [shape: bf16[128,128], index: 0, kind: input, shape index: {}]   ;;  %s1953_s1 = inlined_call_operand.vmem [shape: bf16[128,128], index: 1, kind: input, shape index: {}]   ;;  %s1954_s2 = inlined_call_operand.vmem [shape: f32[128,1], index: 2, kind: input, shape index: {}]   ;;  %s1955_s3 = inlined_call_operand.vmem [shape: bf16[128,128], index: 3, kind: input, shape index: {}]   ;;  %s1956_s4 = inlined_call_operand.vmem [shape: f32[128,1], index: 4, kind: input, shape index: {}]   ;;  %s1957_s5 = inlined_call_operand.vmem [shape: bf16[128,128], index: 5, kind: input, shape index: {}]   ;;  %s1958_s6 = inlined_call_operand.hbm [shape: bf16[128,128], index: 6, kind: input, shape index: {}]   ;;  %s1959_s7 = inlined_call_operand.hbm [shape: f32[128,128], index: 7, kind: output, shape index: {}]  }
   0x1   :  { %13 = vsyncpa [#allocation5], 0  ;;  %s1545_s24 = smov [#allocation3]   ;;  %s1497_s28 = scalar_lea.hbm %s1958_s6, 1024 }
   0x2   :  { %s31_s25 = sshll.u32 %s1545_s24, 4  ;;  %p1498_p0 = scmp.ne.s32.totalorder %s1958_s6, %s1497_s28  ;;  %s32_s25 = int_to_ptr.vmem [resolvable:$true] %s31_s25 }
   0x3   :  { %p1501_p1 = scmp.lt.u32.totalorder %s1497_s28, %s1958_s6 }
   0x5   :  { %p1503_p2 = pnand %p1501_p1, %p1498_p0 }
   0x7   :  { %1506 = shalt.err (!%p1503_p2)
}
   0x8   :  { %s1507_s10 = scalar_lea.vmem %s32_s25, 1024  ;;  %p1512_p4 = scmp.lt.s32.totalorder %s32_s25, %s32_s25 }
   0x9   :  { %p1508_p3 = scmp.ne.s32.totalorder %s32_s25, %s1507_s10  ;;  %p1513_p5 = scmp.lt.s32.totalorder %s1507_s10, %s1507_s10 }
   0xb   :  { %p1514_p6 = por %p1513_p5, %p1512_p4 }
   0xd   :  { %p1515_p7 = pnand %p1514_p6, %p1508_p3 }
   0xf   :  { %1518 = shalt.err (!%p1515_p7)
}
  0x10   :  { %s1546_s11 = smov 64   ;;  %s1547_s12 = smov 4  }
  0x11   :  { %37 = dma.hbm_to_vmem [thread:$0]  %s1958_s6, 1024, %s32_s25, [#allocation4], %s1546_s11, %s1546_s11, %s1547_s12  }
  0x12   :  { %1541 = dma.done.wait [#allocation4], 1024  }
  0x13   :  { %1542 = vsyncadd [#allocation4], 4294966272  ;;  %v1548_v0 = vmov 0   ;;  %v1433_v1 = vld [vmem:[%s1955_s3] sm:$0xff]   ;;  %v1434_v2 = vld [vmem:[%s1955_s3 + $0x8] sm:$0xff]  }
  0x14   :  { %1431 = vset.pattern.permute.xlu0 %v1548_v0  ;;  %1432 = vset.pattern.permute.xlu1 %v1548_v0  ;;  %v1435_v3 = vld [vmem:[%s1955_s3 + $0x10] sm:$0xff]   ;;  %v1436_v4 = vld [vmem:[%s1955_s3 + $0x18] sm:$0xff]   ;;  %v1441_v5 = vld [vmem:[%s1952_s0] sm:$0xff]  }
  0x15   :  { %1312 = vmatprep.subr.bf16.mxu0 %v1433_v1  ;;  %1328 = vmatprep.mubr.bf16.mxu0 %v1441_v5  ;;  %v1437_v6 = vld [vmem:[%s1955_s3 + $0x20] sm:$0xff]   ;;  %v1438_v8 = vld [vmem:[%s1955_s3 + $0x28] sm:$0xff]   ;;  %v269_v9 = vld [vmem:[%s1954_s2 + $0x10] sm:$0xff] }
  0x16   :  { %1313 = vmatpush3.bf16.msra.mxu0 %v1433_v1  ;;  %v267_v7 = vld [vmem:[%s1954_s2] sm:$0xff]  ;;  %v268_v10 = vld [vmem:[%s1954_s2 + $0x8] sm:$0xff]  ;;  %295 = vperm.xlu1 %1432, %v269_v9   ;;  %v270_v11 = vld [vmem:[%s1954_s2 + $0x18] sm:$0xff] }
  0x17   :  { %1314 = vmatprep.subr.bf16.mxu0 %v1434_v2  ;;  %285 = vperm.xlu0 %1431, %v267_v7   ;;  %v1439_v12 = vld [vmem:[%s1955_s3 + $0x30] sm:$0xff]   ;;  %v271_v13 = vld [vmem:[%s1954_s2 + $0x20] sm:$0xff]  ;;  %v272_v14 = vld [vmem:[%s1954_s2 + $0x28] sm:$0xff] }
  0x18   :  { %v1440_v15 = vld [vmem:[%s1955_s3 + $0x38] sm:$0xff]   ;;  %v273_v16 = vld [vmem:[%s1954_s2 + $0x30] sm:$0xff]  ;;  %v275_v18 = vld [vmem:[%s1954_s2 + $0x40] sm:$0xff] }
  0x19   :  { %v274_v17 = vld [vmem:[%s1954_s2 + $0x38] sm:$0xff]  ;;  %v1442_v19 = vld [vmem:[%s1952_s0 + $0x8] sm:$0xff]   ;;  %v1443_v21 = vld [vmem:[%s1952_s0 + $0x10] sm:$0xff]  }
  0x1a   :  { %1315 = vmatpush3.bf16.msra.mxu0 %v1434_v2  ;;  %300 = vperm.xlu1 %1432, %v270_v11   ;;  %v276_v20 = vld [vmem:[%s1954_s2 + $0x48] sm:$0xff]  ;;  %v277_v22 = vld [vmem:[%s1954_s2 + $0x50] sm:$0xff]  ;;  %v278_v23 = vld [vmem:[%s1954_s2 + $0x58] sm:$0xff] }
  0x1b   :  { %1316 = vmatprep.subr.bf16.mxu0 %v1435_v3  ;;  %290 = vperm.xlu0 %1431, %v268_v10   ;;  %v279_v24 = vld [vmem:[%s1954_s2 + $0x60] sm:$0xff]  ;;  %v1444_v25 = vld [vmem:[%s1952_s0 + $0x18] sm:$0xff]   ;;  %v280_v26 = vld [vmem:[%s1954_s2 + $0x68] sm:$0xff] }
  0x1c   :  { %v1445_v27 = vld [vmem:[%s1952_s0 + $0x20] sm:$0xff]   ;;  %v281_v28 = vld [vmem:[%s1954_s2 + $0x70] sm:$0xff]  ;;  %v282_v29 = vld [vmem:[%s1954_s2 + $0x78] sm:$0xff] }
  0x1d   :  { %v639_v30 = vld [vmem:[%s1956_s4] sm:$0xff]  ;;  %v1446_v31 = vld [vmem:[%s1952_s0 + $0x28] sm:$0xff]   ;;  %v1447_v33 = vld [vmem:[%s1952_s0 + $0x30] sm:$0xff]  }
  0x1e   :  { %1317 = vmatpush3.bf16.msra.mxu0 %v1435_v3  ;;  %310 = vperm.xlu1 %1432, %v272_v14   ;;  %v640_v32 = vld [vmem:[%s1956_s4 + $0x8] sm:$0xff]  ;;  %v647_v34 = vld [vmem:[%s1956_s4 + $0x40] sm:$0xff]  ;;  %v641_v36 = vld [vmem:[%s1956_s4 + $0x10] sm:$0xff] }
  0x1f   :  { %1318 = vmatprep.subr.bf16.mxu0 %v1436_v4  ;;  %305 = vperm.xlu0 %1431, %v271_v13   ;;  %v648_v35 = vld [vmem:[%s1956_s4 + $0x48] sm:$0xff]  ;;  %v1448_v37 = vld [vmem:[%s1952_s0 + $0x38] sm:$0xff]   ;;  %v649_v39 = vld [vmem:[%s1956_s4 + $0x50] sm:$0xff] }
  0x20   :  { %v642_v38 = vld [vmem:[%s1956_s4 + $0x18] sm:$0xff]  ;;  %v643_v41 = vld [vmem:[%s1956_s4 + $0x20] sm:$0xff]  ;;  %v644_v42 = vld [vmem:[%s1956_s4 + $0x28] sm:$0xff] }
  0x21   :  { %v650_v40 = vld [vmem:[%s1956_s4 + $0x58] sm:$0xff]  ;;  %v651_v43 = vld [vmem:[%s1956_s4 + $0x60] sm:$0xff]  ;;  %v652_v44 = vld [vmem:[%s1956_s4 + $0x68] sm:$0xff] }
  0x22   :  { %1319 = vmatpush3.bf16.msra.mxu0 %v1436_v4  ;;  %320 = vperm.xlu1 %1432, %v274_v17   ;;  %v645_v45 = vld [vmem:[%s1956_s4 + $0x30] sm:$0xff]  ;;  %v646_v46 = vld [vmem:[%s1956_s4 + $0x38] sm:$0xff]  ;;  %v1449_v49 = vld [vmem:[%s1953_s1] sm:$0xff]  }
  0x23   :  { %1320 = vmatprep.subr.bf16.mxu0 %v1437_v6  ;;  %315 = vperm.xlu0 %1431, %v273_v16   ;;  %v653_v47 = vld [vmem:[%s1956_s4 + $0x70] sm:$0xff]  ;;  %v654_v48 = vld [vmem:[%s1956_s4 + $0x78] sm:$0xff] }
  0x24   :  { %1360 = vmatprep.mubr.bf16.mxu1 %v1449_v49  ;;  %v1457_v49 = vld [vmem:[#allocation3] sm:$0xff]  }
  0x26   :  { %1321 = vmatpush3.bf16.msra.mxu0 %v1437_v6  ;;  %330 = vperm.xlu1 %1432, %v276_v20  }
  0x27   :  { %1322 = vmatprep.subr.bf16.mxu0 %v1438_v8  ;;  %325 = vperm.xlu0 %1431, %v275_v18  }
  0x2a   :  { %1323 = vmatpush3.bf16.msra.mxu0 %v1438_v8  ;;  %340 = vperm.xlu1 %1432, %v278_v23  }
  0x2b   :  { %1324 = vmatprep.subr.bf16.mxu0 %v1439_v12  ;;  %335 = vperm.xlu0 %1431, %v277_v22  }
  0x2e   :  { %1325 = vmatpush3.bf16.msra.mxu0 %v1439_v12  ;;  %350 = vperm.xlu1 %1432, %v280_v26  }
  0x2f   :  { %1326 = vmatprep.subr.bf16.mxu0 %v1440_v15  ;;  %345 = vperm.xlu0 %1431, %v279_v24  }
  0x32   :  { %1327 = vmatpush3.bf16.msra.mxu0 %v1440_v15  ;;  %360 = vperm.xlu1 %1432, %v282_v29  }
  0x33   :  { %355 = vperm.xlu0 %1431, %v281_v28   ;;  %1376 = vmatprep.subr.bf16.mxu0 %v1457_v49 }
  0x35   :  { %1329 = vmatmul.mubr.bf16.vlgmr.msra.gmra.mrb[0].mxu0 %v1442_v19 }
  0x36   :  { %1332 = vmatprep.mubr.bf16.mxu0 %v1443_v21  ;;  %662 = vperm.xlu1 %1432, %v640_v32  }
  0x37   :  { %657 = vperm.xlu0 %1431, %v639_v30   ;;  %1377 = vmatpush3.bf16.msra.mxu0 %v1457_v49 }
  0x3a   :  { %702 = vperm.xlu1 %1432, %v648_v35  }
  0x3b   :  { %697 = vperm.xlu0 %1431, %v647_v34  }
  0x3d   :  { %1333 = vmatmul.mubr.bf16.gmra.mrb[4].mxu0 %v1444_v25 }
  0x3e   :  { %1336 = vmatprep.mubr.bf16.mxu0 %v1445_v27  ;;  %672 = vperm.xlu1 %1432, %v642_v38  }
  0x3f   :  { %667 = vperm.xlu0 %1431, %v641_v36  }
  0x42   :  { %712 = vperm.xlu1 %1432, %v650_v40  }
  0x43   :  { %707 = vperm.xlu0 %1431, %v649_v39  }
  0x45   :  { %1337 = vmatmul.mubr.bf16.gmra.mrb[8].mxu0 %v1446_v31 }
  0x46   :  { %1340 = vmatprep.mubr.bf16.mxu0 %v1447_v33  ;;  %682 = vperm.xlu1 %1432, %v644_v42   ;;  %v1450_v42 = vld [vmem:[%s1953_s1 + $0x8] sm:$0xff]  }
  0x47   :  { %677 = vperm.xlu0 %1431, %v643_v41  }
  0x4a   :  { %722 = vperm.xlu1 %1432, %v652_v44   ;;  %v1452_v44 = vld [vmem:[%s1953_s1 + $0x18] sm:$0xff]  }
  0x4b   :  { %717 = vperm.xlu0 %1431, %v651_v43   ;;  %v1451_v43 = vld [vmem:[%s1953_s1 + $0x10] sm:$0xff]  }
  0x4d   :  { %1341 = vmatmul.mubr.bf16.gmra.mrb[12].mxu0 %v1448_v37 }
  0x4e   :  { %692 = vperm.xlu1 %1432, %v646_v46   ;;  %v1454_v46 = vld [vmem:[%s1953_s1 + $0x28] sm:$0xff]  }
  0x4f   :  { %687 = vperm.xlu0 %1431, %v645_v45   ;;  %v1453_v45 = vld [vmem:[%s1953_s1 + $0x20] sm:$0xff]  }
  0x52   :  { %732 = vperm.xlu1 %1432, %v654_v48   ;;  %v1456_v48 = vld [vmem:[%s1953_s1 + $0x38] sm:$0xff]  }
  0x53   :  { %727 = vperm.xlu0 %1431, %v653_v47   ;;  %v1455_v47 = vld [vmem:[%s1953_s1 + $0x30] sm:$0xff]  }
  0x95   :  { %v296_v51 = vpop.permute.xlu1 %295 }
  0x96   :  { %v286_v50 = vpop.permute.xlu0 %285 }
  0x99   :  { %v301_v53 = vpop.permute.xlu1 %300 }
  0x9a   :  { %v291_v52 = vpop.permute.xlu0 %290 }
  0x9d   :  { %v311_v55 = vpop.permute.xlu1 %310 }
  0x9e   :  { %v306_v54 = vpop.permute.xlu0 %305 }
  0xa1   :  { %v321_v59 = vpop.permute.xlu1 %320 }
  0xa2   :  { %v316_v57 = vpop.permute.xlu0 %315 }
  0xa5   :  { %v331_v5 = vpop.permute.xlu1 %330 }
  0xa6   :  { %v326_v4 = vpop.permute.xlu0 %325 }
  0xa9   :  { %v341_v16 = vpop.permute.xlu1 %340 }
  0xaa   :  { %v336_v14 = vpop.permute.xlu0 %335 }
  0xad   :  { %v351_v25 = vpop.permute.xlu1 %350 }
  0xae   :  { %v346_v21 = vpop.permute.xlu0 %345 }
  0xb1   :  { %v361_v33 = vpop.permute.xlu1 %360 }
  0xb2   :  { %v356_v31 = vpop.permute.xlu0 %355 }
 0x108   :  { %v1330_v56 = vpop.f32.mrb[0].mxu0 }
 0x109   :  { %v204_v58 = vpop.f32.mrb[1].mxu0  ;;  %v365_v61 = vmul.f32 %v1330_v56, %v296_v51  ;;  %v658_v51 = vpop.permute.xlu0 %657 }
 0x10a   :  { %v1331_v60 = vpop.f32.mrb[2].mxu0  ;;  %v363_v0 = vmul.f32 %v286_v50, %v204_v58  ;;  %v1458_v50 = vld [vmem:[#allocation3 + $0x8] sm:$0xff]  }
 0x10b   :  { %v366_v62 = vmul.f32 %v1331_v60, %v301_v53  ;;  %v207_v63 = vpop.f32.mrb[3].mxu0  ;;  %1378 = vmatprep.subr.bf16.mxu0 %v1458_v50 }
 0x10c   :  { %v364_v1 = vmul.f32 %v291_v52, %v207_v63  ;;  %1379 = vmatpush3.bf16.msra.mxu0 %v1458_v50 }
 0x10d   :  { %v396_v2 = vpack.c.bf16 %v366_v62, %v365_v61  ;;  %v698_v52 = vpop.permute.xlu0 %697 }
 0x10e   :  { %v395_v3 = vpack.c.bf16 %v364_v1, %v363_v0 }
 0x110   :  { %v1334_v6 = vpop.f32.mrb[4].mxu0  ;;  %1344 = vmatprep.subr.bf16.mxu1 %v395_v3 }
 0x111   :  { %v220_v7 = vpop.f32.mrb[5].mxu0  ;;  %1345 = vmatpush3.bf16.msra.mxu1 %v395_v3  ;;  %v369_v9 = vmul.f32 %v1334_v6, %v316_v57  ;;  %v668_v53 = vpop.permute.xlu0 %667 }
 0x112   :  { %v1335_v8 = vpop.f32.mrb[6].mxu0  ;;  %1346 = vmatprep.subr.bf16.mxu1 %v396_v2  ;;  %v367_v12 = vmul.f32 %v306_v54, %v220_v7  ;;  %v663_v54 = vpop.permute.xlu1 %662 }
 0x113   :  { %v370_v10 = vmul.f32 %v1335_v8, %v321_v59  ;;  %v223_v11 = vpop.f32.mrb[7].mxu0 }
 0x114   :  { %v368_v13 = vmul.f32 %v311_v55, %v223_v11 }
 0x115   :  { %v398_v15 = vpack.c.bf16 %v370_v10, %v369_v9  ;;  %1347 = vmatpush3.bf16.msra.mxu1 %v396_v2  ;;  %v708_v55 = vpop.permute.xlu0 %707 }
 0x116   :  { %v397_v17 = vpack.c.bf16 %v368_v13, %v367_v12  ;;  %v703_v56 = vpop.permute.xlu1 %702 }
 0x118   :  { %v1338_v18 = vpop.f32.mrb[8].mxu0  ;;  %1348 = vmatprep.subr.bf16.mxu1 %v397_v17 }
 0x119   :  { %v236_v19 = vpop.f32.mrb[9].mxu0  ;;  %1349 = vmatpush3.bf16.msra.mxu1 %v397_v17  ;;  %v373_v22 = vmul.f32 %v1338_v18, %v336_v14  ;;  %v678_v57 = vpop.permute.xlu0 %677 }
 0x11a   :  { %v1339_v20 = vpop.f32.mrb[10].mxu0  ;;  %1350 = vmatprep.subr.bf16.mxu1 %v398_v15  ;;  %v371_v26 = vmul.f32 %v326_v4, %v236_v19  ;;  %v673_v58 = vpop.permute.xlu1 %672 }
 0x11b   :  { %v374_v23 = vmul.f32 %v1339_v20, %v341_v16  ;;  %v239_v24 = vpop.f32.mrb[11].mxu0 }
 0x11c   :  { %v372_v27 = vmul.f32 %v331_v5, %v239_v24 }
 0x11d   :  { %v400_v28 = vpack.c.bf16 %v374_v23, %v373_v22  ;;  %1351 = vmatpush3.bf16.msra.mxu1 %v398_v15  ;;  %v718_v62 = vpop.permute.xlu0 %717 }
 0x11e   :  { %v399_v29 = vpack.c.bf16 %v372_v27, %v371_v26  ;;  %v713_v6 = vpop.permute.xlu1 %712  ;;  %v1459_v26 = vld [vmem:[#allocation3 + $0x10] sm:$0xff]  }
 0x11f   :  { %1380 = vmatprep.subr.bf16.mxu0 %v1459_v26 }
 0x120   :  { %v1342_v30 = vpop.f32.mrb[12].mxu0  ;;  %1352 = vmatprep.subr.bf16.mxu1 %v399_v29  ;;  %1381 = vmatpush3.bf16.msra.mxu0 %v1459_v26 }
 0x121   :  { %v252_v32 = vpop.f32.mrb[13].mxu0  ;;  %1353 = vmatpush3.bf16.msra.mxu1 %v399_v29  ;;  %v377_v35 = vmul.f32 %v1342_v30, %v356_v31  ;;  %v688_v8 = vpop.permute.xlu0 %687 }
 0x122   :  { %v1343_v34 = vpop.f32.mrb[14].mxu0  ;;  %1354 = vmatprep.subr.bf16.mxu1 %v400_v28  ;;  %v375_v38 = vmul.f32 %v346_v21, %v252_v32  ;;  %v683_v14 = vpop.permute.xlu1 %682  ;;  %v1460_v32 = vld [vmem:[#allocation3 + $0x18] sm:$0xff]  }
 0x123   :  { %v378_v36 = vmul.f32 %v1343_v34, %v361_v33  ;;  %v255_v37 = vpop.f32.mrb[15].mxu0  ;;  %1382 = vmatprep.subr.bf16.mxu0 %v1460_v32 }
 0x124   :  { %v376_v39 = vmul.f32 %v351_v25, %v255_v37  ;;  %1383 = vmatpush3.bf16.msra.mxu0 %v1460_v32 }
 0x125   :  { %v402_v40 = vpack.c.bf16 %v378_v36, %v377_v35  ;;  %1355 = vmatpush3.bf16.msra.mxu1 %v400_v28 }
 0x126   :  { %v401_v41 = vpack.c.bf16 %v376_v39, %v375_v38  ;;  %v723_v29 = vpop.permute.xlu1 %722 }
 0x128   :  { %1356 = vmatprep.subr.bf16.mxu1 %v401_v41 }
 0x129   :  { %1357 = vmatpush3.bf16.msra.mxu1 %v401_v41  ;;  %v728_v41 = vpop.permute.xlu0 %727 }
 0x12a   :  { %1358 = vmatprep.subr.bf16.mxu1 %v402_v40  ;;  %v693_v37 = vpop.permute.xlu1 %692 }
 0x12d   :  { %1359 = vmatpush3.bf16.msra.mxu1 %v402_v40  ;;  %v1461_v40 = vld [vmem:[#allocation3 + $0x20] sm:$0xff]  }
 0x12e   :  { %1408 = vmatprep.subr.bf16.mxu1 %v1457_v49  ;;  %1384 = vmatprep.subr.bf16.mxu0 %v1461_v40 }
 0x12f   :  { %1385 = vmatpush3.bf16.msra.mxu0 %v1461_v40 }
 0x130   :  { %1361 = vmatmul.mubr.bf16.vlgmr.msra.gmra.mrb[0].mxu1 %v1450_v42 }
 0x131   :  { %1364 = vmatprep.mubr.bf16.mxu1 %v1451_v43  ;;  %1416 = vmatpush3.bf16.msra.mxu1 %v1457_v49 }
 0x132   :  { %1409 = vmatprep.subr.bf16.mxu1 %v1458_v50 }
 0x135   :  { %1417 = vmatpush3.bf16.msra.mxu1 %v1458_v50 }
 0x136   :  { %1410 = vmatprep.subr.bf16.mxu1 %v1459_v26 }
 0x138   :  { %1365 = vmatmul.mubr.bf16.gmra.mrb[4].mxu1 %v1452_v44 }
 0x139   :  { %1368 = vmatprep.mubr.bf16.mxu1 %v1453_v45  ;;  %1418 = vmatpush3.bf16.msra.mxu1 %v1459_v26 }
 0x13a   :  { %1411 = vmatprep.subr.bf16.mxu1 %v1460_v32 }
 0x13d   :  { %1419 = vmatpush3.bf16.msra.mxu1 %v1460_v32 }
 0x13e   :  { %1412 = vmatprep.subr.bf16.mxu1 %v1461_v40 }
 0x140   :  { %1369 = vmatmul.mubr.bf16.gmra.mrb[8].mxu1 %v1454_v46 }
 0x141   :  { %1372 = vmatprep.mubr.bf16.mxu1 %v1455_v47  ;;  %v1462_v47 = vld [vmem:[#allocation3 + $0x28] sm:$0xff]   ;;  %1420 = vmatpush3.bf16.msra.mxu1 %v1461_v40 }
 0x142   :  { %1386 = vmatprep.subr.bf16.mxu0 %v1462_v47  ;;  %1413 = vmatprep.subr.bf16.mxu1 %v1462_v47 }
 0x143   :  { %1387 = vmatpush3.bf16.msra.mxu0 %v1462_v47 }
 0x145   :  { %1421 = vmatpush3.bf16.msra.mxu1 %v1462_v47 }
 0x148   :  { %1373 = vmatmul.mubr.bf16.gmra.mrb[12].mxu1 %v1456_v48 }
 0x203   :  { %v1362_v59 = vpop.f32.mrb[0].mxu1 }
 0x204   :  { %v1772_v60 = vmul.f32 %v1362_v59, %v668_v53  ;;  %v485_v61 = vpop.f32.mrb[1].mxu1 }
 0x205   :  { %v1774_v63 = vmul.f32 %v658_v51, %v485_v61  ;;  %v1363_v0 = vpop.f32.mrb[2].mxu1  ;;  %v733_v51 = vpop.permute.xlu1 %732 }
 0x206   :  { %v488_v1 = vpop.f32.mrb[3].mxu1  ;;  %v753_v2 = vmul.f32 %v1772_v60, %v1772_v60  ;;  %v1778_v3 = vmul.f32 %v1363_v0, %v673_v58 }
 0x207   :  { %v1780_v4 = vmul.f32 %v663_v54, %v488_v1  ;;  %v751_v5 = vmul.f32 %v1774_v63, %v1774_v63  ;;  %v1226_v1 = vld [vmem:[%s1957_s5] sm:$0xff]  }
 0x208   :  { %771 = vadd.xlane.f32.xlu1 %v753_v2  ;;  %v754_v10 = vmul.f32 %v1778_v3, %v1778_v3 }
 0x209   :  { %767 = vadd.xlane.f32.xlu0 %v751_v5  ;;  %v752_v7 = vmul.f32 %v1780_v4, %v1780_v4 }
 0x20b   :  { %v1366_v9 = vpop.f32.mrb[4].mxu1 }
 0x20c   :  { %v1788_v11 = vmul.f32 %v1366_v9, %v688_v8  ;;  %769 = vadd.xlane.f32.xlu1 %v752_v7  ;;  %v501_v12 = vpop.f32.mrb[5].mxu1 }
 0x20d   :  { %773 = vadd.xlane.f32.xlu0 %v754_v10  ;;  %v1367_v13 = vpop.f32.mrb[6].mxu1  ;;  %v1790_v15 = vmul.f32 %v678_v57, %v501_v12  ;;  %v1227_v10 = vunpack.c.l.bf16 %v1226_v1 }
 0x20e   :  { %v504_v16 = vpop.f32.mrb[7].mxu1  ;;  %v757_v17 = vmul.f32 %v1788_v11, %v1788_v11  ;;  %v1816_v42 = vmul.f32 %v1367_v13, %v693_v37  ;;  %v1228_v13 = vunpack.c.h.bf16 %v1226_v1 }
 0x20f   :  { %v1794_v18 = vmul.f32 %v683_v14, %v504_v16  ;;  %v755_v20 = vmul.f32 %v1790_v15, %v1790_v15  ;;  %v911_v26 = vmul.f32 0.1, %v1227_v10 }
 0x210   :  { %779 = vadd.xlane.f32.xlu1 %v757_v17  ;;  %v758_v49 = vmul.f32 %v1816_v42, %v1816_v42  ;;  %v912_v32 = vmul.f32 0.1, %v1228_v13 }
 0x211   :  { %v756_v19 = vmul.f32 %v1794_v18, %v1794_v18 }
 0x213   :  { %777 = vadd.xlane.f32.xlu0 %v756_v19  ;;  %v1370_v21 = vpop.f32.mrb[8].mxu1 }
 0x214   :  { %v1800_v22 = vmul.f32 %v1370_v21, %v708_v55  ;;  %775 = vadd.xlane.f32.xlu1 %v755_v20  ;;  %v517_v23 = vpop.f32.mrb[9].mxu1  ;;  %v1464_v55 = vld [vmem:[#allocation3 + $0x38] sm:$0xff]  }
 0x215   :  { %v1802_v24 = vmul.f32 %v698_v52, %v517_v23  ;;  %v1371_v25 = vpop.f32.mrb[10].mxu1  ;;  %v1463_v52 = vld [vmem:[#allocation3 + $0x30] sm:$0xff]  }
 0x216   :  { %v520_v27 = vpop.f32.mrb[11].mxu1  ;;  %v761_v28 = vmul.f32 %v1800_v22, %v1800_v22  ;;  %v1806_v30 = vmul.f32 %v1371_v25, %v713_v6  ;;  %1388 = vmatprep.subr.bf16.mxu0 %v1463_v52  ;;  %1414 = vmatprep.subr.bf16.mxu1 %v1463_v52 }
 0x217   :  { %v759_v31 = vmul.f32 %v1802_v24, %v1802_v24  ;;  %v1810_v33 = vmul.f32 %v703_v56, %v520_v27  ;;  %1389 = vmatpush3.bf16.msra.mxu0 %v1463_v52  ;;  %1422 = vmatpush3.bf16.msra.mxu1 %v1463_v52 }
 0x218   :  { %787 = vadd.xlane.f32.xlu1 %v761_v28  ;;  %v762_v35 = vmul.f32 %v1806_v30, %v1806_v30  ;;  %1390 = vmatprep.subr.bf16.mxu0 %v1464_v55 }
 0x219   :  { %783 = vadd.xlane.f32.xlu0 %v759_v31  ;;  %v760_v45 = vmul.f32 %v1810_v33, %v1810_v33  ;;  %1415 = vmatprep.subr.bf16.mxu1 %v1464_v55 }
 0x21b   :  { %v1374_v34 = vpop.f32.mrb[12].mxu1  ;;  %1391 = vmatpush3.bf16.msra.mxu0 %v1464_v55  ;;  %1423 = vmatpush3.bf16.msra.mxu1 %v1464_v55 }
 0x21c   :  { %v533_v36 = vpop.f32.mrb[13].mxu1  ;;  %v1818_v44 = vmul.f32 %v1374_v34, %v728_v41 }
 0x21d   :  { %v1814_v38 = vmul.f32 %v718_v62, %v533_v36  ;;  %789 = vadd.xlane.f32.xlu0 %v762_v35  ;;  %v1375_v39 = vpop.f32.mrb[14].mxu1  ;;  %v1257_v62 = vld [vmem:[%s1957_s5 + $0x8] sm:$0xff]  }
 0x21e   :  { %v536_v43 = vpop.f32.mrb[15].mxu1  ;;  %v765_v50 = vmul.f32 %v1818_v44, %v1818_v44  ;;  %v1830_v53 = vmul.f32 %v1375_v39, %v733_v51  ;;  %v1231_v5 = vunpack.c.l.bf16 %v1257_v62  ;;  %v1232_v17 = vunpack.c.h.bf16 %v1257_v62 }
 0x21f   :  { %v763_v46 = vmul.f32 %v1814_v38, %v1814_v38  ;;  %v1824_v48 = vmul.f32 %v723_v29, %v536_v43 }
 0x220   :  { %v766_v56 = vmul.f32 %v1830_v53, %v1830_v53  ;;  %v913_v21 = vmul.f32 0.1, %v1231_v5  ;;  %v914_v34 = vmul.f32 0.1, %v1232_v17 }
 0x221   :  { %785 = vadd.xlane.f32.xlu0 %v760_v45  ;;  %791 = vadd.xlane.f32.xlu1 %v763_v46  ;;  %v764_v54 = vmul.f32 %v1824_v48, %v1824_v48 }
 0x225   :  { %781 = vadd.xlane.f32.xlu0 %v758_v49  ;;  %795 = vadd.xlane.f32.xlu1 %v765_v50 }
 0x229   :  { %793 = vadd.xlane.f32.xlu0 %v764_v54 }
 0x22d   :  { %797 = vadd.xlane.f32.xlu0 %v766_v56 }
 0x295   :  { %v772_v57 = vpop.xlane.xlu1 %771 }
 0x296   :  { %1465 = vrsqrt.f32 %v772_v57  ;;  %v768_v58 = vpop.xlane.xlu0 %767  ;;  %vm801_vm0 = vcmp.gt.f32.partialorder %v772_v57, 0.0 }
 0x297   :  { %1467 = vrsqrt.f32 %v768_v58  ;;  %vm799_vm1 = vcmp.gt.f32.partialorder %v768_v58, 0.0 }
 0x299   :  { %v770_v59 = vpop.xlane.xlu1 %769 }
 0x29a   :  { %1469 = vrsqrt.f32 %v770_v59  ;;  %v774_v61 = vpop.xlane.xlu0 %773  ;;  %vm800_vm2 = vcmp.gt.f32.partialorder %v770_v59, 0.0 }
 0x29b   :  { %1471 = vrsqrt.f32 %v774_v61  ;;  %vm802_vm3 = vcmp.gt.f32.partialorder %v774_v61, 0.0 }
 0x29d   :  { %v1839_v0 = vpop.xlane.xlu1 %779 }
 0x29e   :  { %vm805_vm9 = vcmp.gt.f32.partialorder %v1839_v0, 0.0 }
 0x2a0   :  { %v1466_v2 = vpop.eup %1465  ;;  %v778_v6 = vpop.xlane.xlu0 %777 }
 0x2a1   :  { %v1468_v7 = vpop.eup %1467  ;;  %v833_v8 = vsel %vm801_vm0, %v1466_v2, 0.0  ;;  %1473 = vrsqrt.f32 %v778_v6  ;;  %v776_v9 = vpop.xlane.xlu1 %775  ;;  %vm804_vm4 = vcmp.gt.f32.partialorder %v778_v6, 0.0 }
 0x2a2   :  { %v831_v12 = vsel %vm799_vm1, %v1468_v7, 0.0  ;;  %1475 = vrsqrt.f32 %v776_v9  ;;  %v849_v14 = vmul.f32 %v833_v8, %v1772_v60  ;;  %v1258_v60 = vld [vmem:[%s1957_s5 + $0x10] sm:$0xff]   ;;  %vm803_vm5 = vcmp.gt.f32.partialorder %v776_v9, 0.0  ;;  %v1259_v8 = vld [vmem:[%s1957_s5 + $0x18] sm:$0xff]  }
 0x2a3   :  { %v847_v16 = vmul.f32 %v831_v12, %v1774_v63  ;;  %v1236_v39 = vunpack.c.h.bf16 %v1258_v60  ;;  %v1235_v43 = vunpack.c.l.bf16 %v1258_v60 }
 0x2a4   :  { %v1470_v19 = vpop.eup %1469  ;;  %v865_v63 = vmul.f32 0.9, %v849_v14  ;;  %v1261_v14 = vld [vmem:[%s1957_s5 + $0x28] sm:$0xff]  }
 0x2a5   :  { %v1472_v20 = vpop.eup %1471  ;;  %v832_v23 = vsel %vm800_vm2, %v1470_v19, 0.0  ;;  %v788_v25 = vpop.xlane.xlu1 %787  ;;  %v863_v27 = vmul.f32 0.9, %v847_v16  ;;  %v916_v55 = vmul.f32 0.1, %v1236_v39  ;;  %v1239_v19 = vunpack.c.l.bf16 %v1259_v8 }
 0x2a6   :  { %v848_v28 = vmul.f32 %v832_v23, %v1780_v4  ;;  %v834_v29 = vsel %vm802_vm3, %v1472_v20, 0.0  ;;  %v784_v31 = vpop.xlane.xlu0 %783  ;;  %1477 = vrsqrt.f32 %v788_v25  ;;  %v1856_v46 = vadd.f32 %v913_v21, %v865_v63 }
 0x2a7   :  { %v850_v35 = vmul.f32 %v834_v29, %v1778_v3  ;;  %1479 = vrsqrt.f32 %v784_v31  ;;  %v1852_v4 = vadd.f32 %v911_v26, %v863_v27  ;;  %v915_v59 = vmul.f32 0.1, %v1235_v43 }
 0x2a8   :  { %v864_v36 = vmul.f32 0.9, %v848_v28  ;;  %1481 = vrsqrt.f32 %v1839_v0  ;;  %vm807_vm6 = vcmp.gt.f32.partialorder %v784_v31, 0.0  ;;  %vm809_vm7 = vcmp.gt.f32.partialorder %v788_v25, 0.0 }
 0x2a9   :  { %v866_v37 = vmul.f32 0.9, %v850_v35  ;;  %v1248_v20 = vunpack.c.h.bf16 %v1261_v14  ;;  %v1247_v29 = vunpack.c.l.bf16 %v1261_v14  ;;  %v1240_v63 = vunpack.c.h.bf16 %v1259_v8 }
 0x2aa   :  { %v790_v40 = vpop.xlane.xlu0 %789  ;;  %v1854_v41 = vadd.f32 %v912_v32, %v864_v36 }
 0x2ab   :  { %v1474_v45 = vpop.eup %1473  ;;  %v1858_v47 = vadd.f32 %v914_v34, %v866_v37  ;;  %1483 = vrsqrt.f32 %v790_v40  ;;  %vm810_vm8 = vcmp.gt.f32.partialorder %v790_v40, 0.0  ;;  %v917_v34 = vmul.f32 0.1, %v1239_v19 }
 0x2ac   :  { %v1476_v3 = vpop.eup %1475  ;;  %v836_v49 = vsel %vm804_vm4, %v1474_v45, 0.0  ;;  %v943_v50 = vpack.c.bf16 %v1854_v41, %v1852_v4  ;;  %v922_v36 = vmul.f32 0.1, %v1248_v20  ;;  %v921_v45 = vmul.f32 0.1, %v1247_v29 }
 0x2ad   :  { %v944_v51 = vpack.c.bf16 %v1858_v47, %v1856_v46  ;;  %v852_v52 = vmul.f32 %v836_v49, %v1794_v18  ;;  %v835_v54 = vsel %vm803_vm5, %v1476_v3, 0.0 }
 0x2ae   :  { %v851_v56 = vmul.f32 %v835_v54, %v1790_v15  ;;  %1392 = vmatprep.mubr.bf16.mxu0 %v943_v50  ;;  %v786_v57 = vpop.xlane.xlu0 %785  ;;  %v792_v58 = vpop.xlane.xlu1 %791  ;;  %v1260_v15 = vld [vmem:[%s1957_s5 + $0x20] sm:$0xff]  }
 0x2af   :  { %v868_v61 = vmul.f32 0.9, %v852_v52  ;;  %1485 = vrsqrt.f32 %v786_v57  ;;  %1393 = vmatmul.mubr.bf16.vlgmr.msra.gmra.mrb[16].mxu0 %v944_v51  ;;  %v1243_v17 = vunpack.c.l.bf16 %v1260_v15  ;;  %v1244_v25 = vunpack.c.h.bf16 %v1260_v15  ;;  %v1263_v15 = vld [vmem:[%s1957_s5 + $0x38] sm:$0xff]  }
 0x2b0   :  { %v867_v62 = vmul.f32 0.9, %v851_v56  ;;  %1487 = vrsqrt.f32 %v792_v58  ;;  %v1478_v1 = vpop.eup %1477  ;;  %vm808_vm10 = vcmp.gt.f32.partialorder %v786_v57, 0.0  ;;  %vm811_vm11 = vcmp.gt.f32.partialorder %v792_v58, 0.0 }
 0x2b1   :  { %v1866_v2 = vadd.f32 %v916_v55, %v868_v61  ;;  %v1480_v5 = vpop.eup %1479  ;;  %v841_v16 = vsel %vm809_vm7, %v1478_v1, 0.0  ;;  %v919_v60 = vmul.f32 0.1, %v1243_v17  ;;  %v1255_v17 = vunpack.c.l.bf16 %v1263_v15 }
 0x2b2   :  { %v782_v6 = vpop.xlane.xlu0 %781  ;;  %v1868_v7 = vpop.xlane.xlu1 %795  ;;  %v1870_v18 = vadd.f32 %v915_v59, %v867_v62  ;;  %v839_v10 = vsel %vm807_vm6, %v1480_v5, 0.0  ;;  %v857_v31 = vmul.f32 %v841_v16, %v1800_v22  ;;  %v920_v22 = vmul.f32 0.1, %v1244_v25 }
 0x2b3   :  { %1489 = vrsqrt.f32 %v782_v6  ;;  %v1482_v9 = vpop.eup %1481  ;;  %v855_v27 = vmul.f32 %v839_v10, %v1802_v24  ;;  %v1262_v24 = vld [vmem:[%s1957_s5 + $0x30] sm:$0xff]   ;;  %vm806_vm12 = vcmp.gt.f32.partialorder %v782_v6, 0.0  ;;  %vm813_vm13 = vcmp.gt.f32.partialorder %v1868_v7, 0.0  ;;  %s1549_s5 = smov [#allocation6]  }
 0x2b4   :  { %1491 = vrsqrt.f32 %v1868_v7  ;;  %v945_v12 = vpack.c.bf16 %v1866_v2, %v1870_v18  ;;  %v837_v26 = vsel %vm805_vm9, %v1482_v9, 0.0  ;;  %v873_v3 = vmul.f32 0.9, %v857_v31  ;;  %s1181_s11 = sshll.u32 %s1549_s5, 4  ;;  %s1182_s11 = int_to_ptr.vmem [resolvable:$true] %s1181_s11 }
 0x2b5   :  { %v1484_v13 = vpop.eup %1483  ;;  %v853_v35 = vmul.f32 %v837_v26, %v1788_v11  ;;  %v918_v11 = vmul.f32 0.1, %v1240_v63  ;;  %v1251_v52 = vunpack.c.l.bf16 %v1262_v24  ;;  %v1252_v59 = vunpack.c.h.bf16 %v1262_v24  ;;  %s1519_s12 = scalar_lea.vmem %s1182_s11, 2048  ;;  %p1524_p9 = scmp.lt.s32.totalorder %s1182_s11, %s1182_s11 }
 0x2b6   :  { %v842_v21 = vsel %vm810_vm8, %v1484_v13, 0.0  ;;  %1396 = vmatprep.mubr.bf16.mxu0 %v945_v12  ;;  %v794_v23 = vpop.xlane.xlu0 %793  ;;  %v937_v1 = vadd.f32 %v921_v45, %v873_v3  ;;  %v1256_v20 = vunpack.c.h.bf16 %v1263_v15  ;;  %p1520_p8 = scmp.ne.s32.totalorder %s1182_s11, %s1519_s12  ;;  %p1525_p10 = scmp.lt.s32.totalorder %s1519_s12, %s1519_s12 }
 0x2b7   :  { %v858_v28 = vmul.f32 %v842_v21, %v1806_v30  ;;  %1493 = vrsqrt.f32 %v794_v23  ;;  %v871_v30 = vmul.f32 0.9, %v855_v27  ;;  %v869_v55 = vmul.f32 0.9, %v853_v35 }
 0x2b8   :  { %vm812_vm14 = vcmp.gt.f32.partialorder %v794_v23, 0.0  ;;  %v923_v10 = vmul.f32 0.1, %v1251_v52  ;;  %v924_v12 = vmul.f32 0.1, %v1252_v59  ;;  %v1122_v52 = vmul.f32 0.5, %v937_v1  ;;  %p1526_p11 = por %p1525_p10, %p1524_p9 }
 0x2b9   :  { %v1486_v32 = vpop.eup %1485  ;;  %v874_v37 = vmul.f32 0.9, %v858_v28  ;;  %v1897_v58 = vadd.f32 %v919_v60, %v871_v30  ;;  %v933_v7 = vadd.f32 %v917_v34, %v869_v55  ;;  %v926_v31 = vmul.f32 0.1, %v1256_v20 }
 0x2ba   :  { %v1488_v0 = vpop.eup %1487  ;;  %v840_v39 = vsel %vm808_vm10, %v1486_v32, 0.0  ;;  %v798_v40 = vpop.xlane.xlu0 %797  ;;  %v1117_v20 = vmul.f32 0.5, %v1866_v2  ;;  %p1527_p12 = pnand %p1526_p11, %p1520_p8 }
 0x2bb   :  { %v856_v43 = vmul.f32 %v840_v39, %v1810_v33  ;;  %v843_v49 = vsel %vm811_vm11, %v1488_v0, 0.0  ;;  %1495 = vrsqrt.f32 %v798_v40  ;;  %v1893_v56 = vadd.f32 %v922_v36, %v874_v37 }
 0x2bc   :  { %v859_v61 = vmul.f32 %v843_v49, %v1814_v38  ;;  %vm814_vm15 = vcmp.gt.f32.partialorder %v798_v40, 0.0  ;;  %v1114_v36 = vmul.f32 0.5, %v1856_v46  ;;  %v1113_v49 = vmul.f32 0.5, %v1854_v41 }
 0x2bd   :  { %v1490_v50 = vpop.eup %1489  ;;  %v872_v51 = vmul.f32 0.9, %v856_v43  ;;  %v1115_v43 = vmul.f32 0.5, %v1858_v47  ;;  %v1120_v55 = vmul.f32 0.5, %v1897_v58 }
 0x2be   :  { %v1492_v54 = vpop.eup %1491  ;;  %v838_v57 = vsel %vm806_vm12, %v1490_v50, 0.0  ;;  %v875_v13 = vmul.f32 0.9, %v859_v61  ;;  %v1123_v61 = vmul.f32 0.5, %v1893_v56 }
 0x2bf   :  { %v854_v33 = vmul.f32 %v838_v57, %v1816_v42  ;;  %v1899_v62 = vadd.f32 %v920_v22, %v872_v51  ;;  %v845_v8 = vsel %vm813_vm13, %v1492_v54, 0.0  ;;  %v948_v42 = vpack.c.bf16 %v1893_v56, %v937_v1 }
 0x2c0   :  { %v861_v19 = vmul.f32 %v845_v8, %v1818_v44  ;;  %v1913_v27 = vadd.f32 %v923_v10, %v875_v13  ;;  %v1116_v10 = vmul.f32 0.5, %v1870_v18 }
 0x2c1   :  { %v1494_v5 = vpop.eup %1493  ;;  %v870_v6 = vmul.f32 0.9, %v854_v33  ;;  %v947_v38 = vpack.c.bf16 %v1899_v62, %v1897_v58 }
 0x2c2   :  { %v844_v9 = vsel %vm812_vm14, %v1494_v5, 0.0  ;;  %v877_v29 = vmul.f32 0.9, %v861_v19  ;;  %v1118_v5 = vmul.f32 0.5, %v933_v7 }
 0x2c3   :  { %v860_v14 = vmul.f32 %v844_v9, %v1824_v48  ;;  %1400 = vmatprep.mubr.bf16.mxu1 %v947_v38  ;;  %v1909_v16 = vadd.f32 %v918_v11, %v870_v6  ;;  %v925_v48 = vmul.f32 0.1, %v1255_v17  ;;  %v1121_v38 = vmul.f32 0.5, %v1899_v62 }
 0x2c4   :  { %1401 = vmatmul.mubr.bf16.vlgmr.msra.gmra.mrb[16].mxu1 %v948_v42 }
 0x2c5   :  { %v876_v21 = vmul.f32 0.9, %v860_v14  ;;  %v946_v23 = vpack.c.bf16 %v1909_v16, %v933_v7  ;;  %v1496_v25 = vpop.eup %1495  ;;  %v1920_v63 = vadd.f32 %v925_v48, %v877_v29  ;;  %v1119_v56 = vmul.f32 0.5, %v1909_v16 }
 0x2c6   :  { %v846_v26 = vsel %vm814_vm15, %v1496_v25, 0.0  ;;  %v1124_v16 = vmul.f32 0.5, %v1913_v27 }
 0x2c7   :  { %1397 = vmatmul.mubr.bf16.gmra.mrb[20].mxu0 %v946_v23  ;;  %v1915_v28 = vadd.f32 %v924_v12, %v876_v21  ;;  %v862_v32 = vmul.f32 %v846_v26, %v1830_v53  ;;  %v1112_v53 = vmul.f32 0.5, %v1852_v4  ;;  %v1126_v25 = vmul.f32 0.5, %v1920_v63 }
 0x2c9   :  { %v949_v44 = vpack.c.bf16 %v1915_v28, %v1913_v27  ;;  %v878_v60 = vmul.f32 0.9, %v862_v32 }
 0x2cb   :  { %1404 = vmatprep.mubr.bf16.mxu1 %v949_v44  ;;  %v1922_v34 = vadd.f32 %v926_v31, %v878_v60 }
 0x2cd   :  { %v950_v0 = vpack.c.bf16 %v1922_v34, %v1920_v63  ;;  %v1127_v2 = vmul.f32 0.5, %v1922_v34 }
 0x2cf   :  { %1405 = vmatmul.mubr.bf16.gmra.mrb[20].mxu1 %v950_v0 }
 0x382   :  { %v1394_v35 = vpop.f32.mrb[16].mxu0 }
 0x383   :  { %v1130_v37 = vmul.f32 0.5, %v1394_v35  ;;  %v1049_v39 = vpop.f32.mrb[17].mxu0  ;;  %v1125_v35 = vmul.f32 0.5, %v1915_v28 }
 0x384   :  { %v1128_v40 = vmul.f32 0.5, %v1049_v39  ;;  %v1395_v24 = vpop.f32.mrb[18].mxu0 }
 0x385   :  { %v1146_v30 = vadd.f32 %v1130_v37, %v1114_v36  ;;  %v1131_v22 = vmul.f32 0.5, %v1395_v24  ;;  %v1052_v45 = vpop.f32.mrb[19].mxu0 }
 0x386   :  { %v1144_v3 = vadd.f32 %v1128_v40, %v1112_v53  ;;  %v1129_v50 = vmul.f32 0.5, %v1052_v45 }
 0x387   :  { %1162 = vst [vmem:[#allocation6 + $0x10] sm:$0xff] %v1146_v30  ;;  %v1147_v51 = vadd.f32 %v1131_v22, %v1115_v43 }
 0x388   :  { %1160 = vst [vmem:[#allocation6] sm:$0xff] %v1144_v3  ;;  %v1145_v11 = vadd.f32 %v1129_v50, %v1113_v49 }
 0x389   :  { %1163 = vst [vmem:[#allocation6 + $0x18] sm:$0xff] %v1147_v51 }
 0x38a   :  { %1161 = vst [vmem:[#allocation6 + $0x8] sm:$0xff] %v1145_v11 }
 0x397   :  { %v1402_v46 = vpop.f32.mrb[16].mxu1 }
 0x398   :  { %v1138_v4 = vmul.f32 0.5, %v1402_v46  ;;  %v1081_v54 = vpop.f32.mrb[17].mxu1 }
 0x399   :  { %v1136_v57 = vmul.f32 0.5, %v1081_v54  ;;  %v1403_v47 = vpop.f32.mrb[18].mxu1 }
 0x39a   :  { %v1154_v59 = vadd.f32 %v1138_v4, %v1122_v52  ;;  %v1139_v33 = vmul.f32 0.5, %v1403_v47  ;;  %v1398_v41 = vpop.f32.mrb[20].mxu0  ;;  %v1084_v6 = vpop.f32.mrb[19].mxu1 }
 0x39b   :  { %v1152_v15 = vadd.f32 %v1136_v57, %v1120_v55  ;;  %v1134_v8 = vmul.f32 0.5, %v1398_v41  ;;  %v1137_v42 = vmul.f32 0.5, %v1084_v6  ;;  %v1065_v9 = vpop.f32.mrb[21].mxu0 }
 0x39c   :  { %1170 = vst [vmem:[#allocation6 + $0x50] sm:$0xff] %v1154_v59  ;;  %v1155_v1 = vadd.f32 %v1139_v33, %v1123_v61  ;;  %v1132_v58 = vmul.f32 0.5, %v1065_v9  ;;  %v1399_v12 = vpop.f32.mrb[22].mxu0 }
 0x39d   :  { %1168 = vst [vmem:[#allocation6 + $0x40] sm:$0xff] %v1152_v15  ;;  %v1150_v13 = vadd.f32 %v1134_v8, %v1118_v5  ;;  %v1153_v14 = vadd.f32 %v1137_v42, %v1121_v38  ;;  %v1135_v17 = vmul.f32 0.5, %v1399_v12  ;;  %v1068_v7 = vpop.f32.mrb[23].mxu0 }
 0x39e   :  { %1171 = vst [vmem:[#allocation6 + $0x58] sm:$0xff] %v1155_v1  ;;  %v1148_v19 = vadd.f32 %v1132_v58, %v1116_v10  ;;  %v1133_v62 = vmul.f32 0.5, %v1068_v7 }
 0x39f   :  { %1166 = vst [vmem:[#allocation6 + $0x30] sm:$0xff] %v1150_v13  ;;  %1169 = vst [vmem:[#allocation6 + $0x48] sm:$0xff] %v1153_v14  ;;  %v1151_v21 = vadd.f32 %v1135_v17, %v1119_v56 }
 0x3a0   :  { %1164 = vst [vmem:[#allocation6 + $0x20] sm:$0xff] %v1148_v19  ;;  %v1149_v23 = vadd.f32 %v1133_v62, %v1117_v20 }
 0x3a1   :  { %1167 = vst [vmem:[#allocation6 + $0x38] sm:$0xff] %v1151_v21 }
 0x3a2   :  { %1165 = vst [vmem:[#allocation6 + $0x28] sm:$0xff] %v1149_v23  ;;  %v1406_v18 = vpop.f32.mrb[20].mxu1 }
 0x3a3   :  { %v1142_v26 = vmul.f32 0.5, %v1406_v18  ;;  %v1097_v48 = vpop.f32.mrb[21].mxu1 }
 0x3a4   :  { %v1140_v29 = vmul.f32 0.5, %v1097_v48  ;;  %v1407_v31 = vpop.f32.mrb[22].mxu1 }
 0x3a5   :  { %v1158_v32 = vadd.f32 %v1142_v26, %v1126_v25  ;;  %v1143_v44 = vmul.f32 0.5, %v1407_v31  ;;  %v1100_v60 = vpop.f32.mrb[23].mxu1 }
 0x3a6   :  { %v1156_v0 = vadd.f32 %v1140_v29, %v1124_v16  ;;  %v1141_v36 = vmul.f32 0.5, %v1100_v60 }
 0x3a7   :  { %1174 = vst [vmem:[#allocation6 + $0x70] sm:$0xff] %v1158_v32  ;;  %v1159_v37 = vadd.f32 %v1143_v44, %v1127_v2 }
 0x3a8   :  { %1172 = vst [vmem:[#allocation6 + $0x60] sm:$0xff] %v1156_v0  ;;  %v1157_v63 = vadd.f32 %v1141_v36, %v1125_v35 }
 0x3a9   :  { %1175 = vst [vmem:[#allocation6 + $0x78] sm:$0xff] %v1159_v37 }
 0x3aa   :  { %1173 = vst [vmem:[#allocation6 + $0x68] sm:$0xff] %v1157_v63 }
 0x3ab   :  { %1530 = shalt.err (!%p1527_p12)
}
 0x3ac   :  { %s1531_s15 = scalar_lea.hbm %s1959_s7, 2048 }
 0x3ad   :  { %p1532_p13 = scmp.ne.s32.totalorder %s1959_s7, %s1531_s15  ;;  %p1535_p0 = scmp.lt.u32.totalorder %s1531_s15, %s1959_s7 }
 0x3af   :  { %p1537_p1 = pnand %p1535_p0, %p1532_p13 }
 0x3b1   :  { %1540 = shalt.err (!%p1537_p1)
}
 0x3b2   :  { %s1550_s20 = smov 128   ;;  %s1551_s6 = smov 8  }
 0x3b3   :  { %1187 = dma.vmem_to_hbm [thread:$0]  %s1182_s11, 2048, %s1959_s7, [#allocation5], %s1550_s20, %s1550_s20, %s1551_s6  }
 0x3b4   :  { %1543 = dma.done.wait [#allocation5], 2048  }
 0x3b5   :  { %1544 = vsyncadd [#allocation5], 4294965248 }
 0x3b6   :  { %1191 = vsyncpa [#allocation4], 1 }
 0x3b7   :  { %1192 = vsyncpa [#allocation5], 1 }

</bundles_post_ra>
